<compile_context>
chip_gen: v7x
topology: tpu7x:2x2x1
jax: 0.10.0
libtpu: 0.0.40
codegen_flags: <defaults>
</compile_context>

<pallas_src>
import jax
import jax.numpy as jnp
from jax.experimental import pallas as pl
from jax.experimental.pallas import tpu as pltpu


def dice_kernel(alpha_ref, x_ref, o_ref):
    # x_ref: (B, TH) tile; full batch resident so the dim-0 reduction is local.
    x = x_ref[...].astype(jnp.float32)
    n = x.shape[0]

    mean = jnp.mean(x, axis=0, keepdims=True)                    # (1, TH)
    centered = x - mean
    # torch.std(dim=0) is the unbiased estimator (divide by n-1).
    # NOTE: B == 1 or a zero-variance column yields NaN, matching the
    # PyTorch reference semantics exactly (no eps in the denominator).
    var = jnp.sum(centered * centered, axis=0, keepdims=True) * (1.0 / (n - 1))
    inv_std = jax.lax.rsqrt(var)                                 # (1, TH), EUP

    norm = centered * inv_std
    p = jax.nn.sigmoid(norm + 1e-8)

    # x*p + alpha*x*(1-p) == x * (alpha + (1 - alpha) * p)
    alpha = alpha_ref[0]                                         # scalar (SMEM)
    gate = alpha + (1.0 - alpha) * p
    o_ref[...] = (x * gate).astype(o_ref.dtype)


def _choose_tile_h(B, H, dtype_bytes, budget_bytes):
    """Largest lane-aligned tile width that fits the VMEM budget."""
    if H % 128 != 0:
        # Last dim must be a multiple of 128 or the full extent.
        return H
    # Per-lane VMEM cost: double-buffered in + out tiles in the native dtype
    # plus ~3 full-tile f32 temporaries inside the kernel body.
    per_lane = B * (2 * 2 * dtype_bytes + 3 * 4)
    max_lanes = max(128, (budget_bytes // per_lane) // 128 * 128)
    tile = min(H, max_lanes)
    while H % tile != 0:
        tile -= 128
    # Keep >= 2 grid steps when possible so v7x's two TensorCores both work.
    if tile == H and H >= 256 and (H // 2) % 128 == 0:
        tile = H // 2
    return tile


def dice(x, alpha, *, tile_h=None, vmem_budget_bytes=40 << 20):
    B, H = x.shape
    dtype_bytes = jnp.dtype(x.dtype).itemsize
    if tile_h is None:
        tile_h = _choose_tile_h(B, H, dtype_bytes, vmem_budget_bytes)
    if H % tile_h != 0 or (tile_h != H and tile_h % 128 != 0):
        tile_h = H  # fall back to a single full-width tile

    # TODO(synk): for batches too large to hold (B, tile_h) resident in VMEM,
    # switch to a two-pass scheme (pass 1: accumulate per-feature sum /
    # sum-of-squares over a B grid axis; pass 2: stream x again to apply the
    # gate). Current design needs the full batch per tile.

    return pl.pallas_call(
        dice_kernel,
        out_shape=jax.ShapeDtypeStruct((B, H), x.dtype),
        grid=(H // tile_h,),
        in_specs=[
            pl.BlockSpec(memory_space=pltpu.MemorySpace.SMEM),    # alpha (1,)
            pl.BlockSpec((B, tile_h), lambda j: (0, j)),          # x tile
        ],
        out_specs=pl.BlockSpec((B, tile_h), lambda j: (0, j)),
        compiler_params=pltpu.CompilerParams(
            dimension_semantics=("parallel",),
            vmem_limit_bytes=48 << 20,   # <= ~48 MiB keeps v7x (64 MiB) happy
        ),
    )(alpha, x)


def dice_ref(x, alpha):
    avg = jnp.mean(x, axis=0)
    std = jnp.std(x, axis=0, ddof=1)
    norm = (x - avg) / std
    p = jax.nn.sigmoid(norm + 1e-8)
    return x * p + alpha[0] * (x * (1.0 - p))


if __name__ == "__main__":
    key = jax.random.PRNGKey(0)
    B, H = 8, 256
    x = jax.random.normal(key, (B, H), dtype=jnp.float32)

    # Deterministic parameter init, matching nn.Parameter(torch.zeros((1,))).
    alpha = jnp.zeros((1,), dtype=jnp.float32)

    out = dice(x, alpha)
    out = jax.block_until_ready(out)

    ref = dice_ref(x, alpha)
    assert out.shape == x.shape and out.dtype == x.dtype
    assert jnp.allclose(out, ref, atol=1e-5, rtol=1e-5), "mismatch vs reference"

    print("KERNEL_OK")
</pallas_src>

<mosaic_0001>
module attributes {stable_mosaic.version = 11 : i64} {
  func.func @dice_kernel(%arg0: i32, %arg1: memref<1xf32, #tpu.memory_space<smem>>, %arg2: memref<8x128xf32, #tpu.memory_space<vmem>>, %arg3: memref<8x128xf32, #tpu.memory_space<vmem>>) attributes {dimension_semantics = [#tpu.dimension_semantics<parallel>], iteration_bounds = array<i64: 2>, scalar_prefetch = 0 : i64, scratch_operands = 0 : i64, tpu.core_type = #tpu.core_type<tc>, window_params = [{transform_indices = @transform_0, window_bounds = array<i64: 1>}, {transform_indices = @transform_1, window_bounds = array<i64: 8, 128>}, {transform_indices = @transform_2, window_bounds = array<i64: 8, 128>}]} {
    %c0 = arith.constant 0 : index
    %c0_0 = arith.constant 0 : index
    %0 = vector.load %arg2[%c0, %c0_0] : memref<8x128xf32, #tpu.memory_space<vmem>>, vector<8x128xf32>
    %cst = arith.constant dense<0.000000e+00> : vector<128xf32>
    %1 = vector.multi_reduction <add>, %0, %cst [0] : vector<8x128xf32> to vector<128xf32>
    %2 = vector.shape_cast %1 : vector<128xf32> to vector<1x128xf32>
    %cst_1 = arith.constant 8.000000e+00 : f32
    %3 = vector.broadcast %cst_1 : f32 to vector<1x128xf32>
    %4 = arith.divf %2, %3 : vector<1x128xf32>
    %5 = vector.broadcast %4 : vector<1x128xf32> to vector<8x128xf32>
    %6 = arith.subf %0, %5 : vector<8x128xf32>
    %7 = arith.mulf %6, %6 : vector<8x128xf32>
    %cst_2 = arith.constant dense<0.000000e+00> : vector<128xf32>
    %8 = vector.multi_reduction <add>, %7, %cst_2 [0] : vector<8x128xf32> to vector<128xf32>
    %9 = vector.shape_cast %8 : vector<128xf32> to vector<1x128xf32>
    %cst_3 = arith.constant 0.142857149 : f32
    %10 = vector.broadcast %cst_3 : f32 to vector<1x128xf32>
    %11 = arith.mulf %9, %10 : vector<1x128xf32>
    %12 = math.rsqrt %11 : vector<1x128xf32>
    %13 = vector.broadcast %12 : vector<1x128xf32> to vector<8x128xf32>
    %14 = arith.mulf %6, %13 : vector<8x128xf32>
    %cst_4 = arith.constant 9.99999993E-9 : f32
    %15 = vector.broadcast %cst_4 : f32 to vector<8x128xf32>
    %16 = arith.addf %14, %15 : vector<8x128xf32>
    %17 = arith.negf %16 : vector<8x128xf32>
    %18 = math.exp %17 : vector<8x128xf32>
    %cst_5 = arith.constant 1.000000e+00 : f32
    %19 = vector.broadcast %cst_5 : f32 to vector<8x128xf32>
    %20 = arith.addf %19, %18 : vector<8x128xf32>
    %21 = arith.divf %19, %20 : vector<8x128xf32>
    %c0_6 = arith.constant 0 : index
    %22 = memref.load %arg1[%c0_6] : memref<1xf32, #tpu.memory_space<smem>>
    %cst_7 = arith.constant 1.000000e+00 : f32
    %23 = arith.subf %cst_7, %22 : f32
    %24 = vector.broadcast %23 : f32 to vector<8x128xf32>
    %25 = arith.mulf %24, %21 : vector<8x128xf32>
    %26 = vector.broadcast %22 : f32 to vector<8x128xf32>
    %27 = arith.addf %26, %25 : vector<8x128xf32>
    %28 = arith.mulf %0, %27 : vector<8x128xf32>
    %c0_8 = arith.constant 0 : index
    %c0_9 = arith.constant 0 : index
    %29 = vector.load %arg3[%c0_8, %c0_9] : memref<8x128xf32, #tpu.memory_space<vmem>>, vector<8x128xf32>
    tpu.vector_store %arg3[%c0_8, %c0_9], %28 {strides = array<i32>} : memref<8x128xf32, #tpu.memory_space<vmem>>, vector<8x128xf32>,
    return
  }
  func.func @transform_0(%arg0: i32) -> i32 {
    %c0_i32 = arith.constant 0 : i32
    %c0_i32_0 = arith.constant 0 : i32
    return %c0_i32 : i32
  }
  func.func @transform_1(%arg0: i32) -> (i32, i32) {
    %c0_i32 = arith.constant 0 : i32
    %c0_i32_0 = arith.constant 0 : i32
    return %c0_i32, %arg0 : i32, i32
  }
  func.func @transform_2(%arg0: i32) -> (i32, i32) {
    %c0_i32 = arith.constant 0 : i32
    %c0_i32_0 = arith.constant 0 : i32
    return %c0_i32, %arg0 : i32, i32
  }
}

</mosaic_0001>

<bundles_post_ra>
// kernel: tpu_custom_call.1
= control target key start
LH: loop header
LB: loop body
LE: loop exit
PB: predicated region body
PF: predicated region fallthrough
CT: control target
= control target key end

     0   :  { %s627_s0 = inlined_call_operand.<no memory space> [shape: f32[1], index: 0, kind: input, shape index: {}]   ;;  %s628_s1 = inlined_call_operand.hbm [shape: f32[8,256], index: 1, kind: input, shape index: {}]   ;;  %s629_s2 = inlined_call_operand.hbm [shape: f32[8,256], index: 2, kind: output, shape index: {}]  }
   0x1   :  { %7 = sst [smem:[#allocation2]] %s627_s0 }
   0x2   :  { %8 = vsyncpa [#allocation4], 0 }
   0x3   :  { %10 = vsyncpa [#allocation4 + $0x1], 0 }
   0x4   :  { %11 = vsyncpa [#allocation5], 0 }
   0x5   :  { %13 = vsyncpa [#allocation5 + $0x1], 0  ;;  %s462_s11 = smov 0   ;;  %s464_s12 = smov 0  }
   0x6   :  { %s466_s13 = smov 0   ;;  %s468_s14 = smov 0  }
   0x7 LB: > { %s483_s0 = sadd.s32 4294967295, %s440_s14   ;;  %s279_s15 = sadd.s32 4294967294, %s440_s14   ;;  %s440_s14 = sphi %s468_s14, %s644_s14   ;;  %s436_s13 = sphi %s466_s13, %s643_s13   ;;  %s432_s12 = sphi %s464_s12, %s642_s12   ;;  %s428_s11 = sphi %s462_s11, %s641_s11  }
   0x8   : > { %s487_s16 = sadd.s32 1, %s440_s14   ;;  %s47_s17 = sadd.s32 1, %s436_s13 }
   0x9   : > { %s44_s18 = ssub.s32 %s440_s14, %s487_s16  ;;  %p54_p0 = scmp.ne.s32.totalorder %s436_s13, %s432_s12 }
   0xa   : > { %p45_p1 = scmp.eq.s32.totalorder %s44_s18, 0  ;;  %p55_p2 = scmp.eq.s32.totalorder %s440_s14, 0 }
   0xb   : > { %p60_p3 = scmp.ne.s32.totalorder %s432_s12, %s428_s11  ;;  %p61_p4 = scmp.eq.s32.totalorder %s483_s0, 0 }
   0xc   : > { %s499_s19 = scalar_select %p45_p1, %s436_s13, %s47_s17  }
   0xd   : > { %p501_p5 = por %p55_p2, %p54_p0  ;;  %p505_p6 = por %p61_p4, %p60_p3 }
   0xe   : > { %p84_p7 = scmp.eq.s32.totalorder %s483_s0, 1  ;;  %p90_p8 = scmp.eq.s32.totalorder %s279_s15, 1 }
   0xf   : > { %p304_p10 = scmp.lt.s32.totalorder %s440_s14, 2  ;;  %s113_s24 = sand.u32 1, %s436_s13  }
  0x10   : > { %p512_p11 = por %p84_p7, %p54_p0  ;;  %p516_p12 = por %p90_p8, %p60_p3 }
  0x11   : > { %s283_s25 = sshll.u32 %s440_s14, 7  ;;  %s282_s26 = sshll.u32 %s113_s24, 3 }
  0x12   : > { %s633_s22 = scalar_select %p512_p11, 1, 0 }
  0x13   : > { %s634_s23 = scalar_select %p516_p12, 1, 0 }
  0x14   : > { %s525_s29 = scalar_lea.hbm %s628_s1, %s283_s25  ;;  %s117_s30 = scalar_lea.vmem [#allocation3], %s282_s26 }
  0x15   : > { %s124_s3 = sshll.u32 %s117_s30, 4  ;;  %p529_p13 = pnand %p304_p10, %p501_p5  ;;  %s533_s3 = int_to_ptr.vmem [resolvable:$true] %s124_s3 }
  0x16   : > { %s114_s5 = scalar_lea.sflag [#allocation4], %s113_s24  ;;  %s344_s6 = scalar_lea.hbm %s525_s29, 128 }
  0x17   : > { %p345_p2 = scmp.ne.s32.totalorder %s525_s29, %s344_s6  ;;  %p346_p3 = pneg %p529_p13 }
  0x18   : > { %s349_s9 = scalar_lea.hbm %s628_s1, 256  ;;  %p350_p5 = scmp.lt.u32.totalorder %s525_s29, %s628_s1 }
  0x19   : > { %p347_p4 = pnand %p346_p3, %p345_p2  ;;  %p351_p8 = scmp.lt.u32.totalorder %s349_s9, %s344_s6 }
  0x1a   : > { %p353_p9 = scmp.lt.u32.totalorder %s344_s6, %s525_s29 }
  0x1b   : > { %p348_p7 = pneg %p347_p4  ;;  %p352_p10 = por %p351_p8, %p350_p5 }
  0x1d   : > { %p354_p0 = por %p353_p9, %p352_p10 }
  0x1f   : > { %p355_p1 = pnand %p354_p0, %p348_p7 }
  0x21   : > { %358 = shalt.err (!%p355_p1)
}
  0x22   : > { %s359_s17 = scalar_lea.vmem %s533_s3, 128  ;;  %s442_s18 = smov [#allocation3]  }
  0x23   : > { %p360_p2 = scmp.ne.s32.totalorder %s533_s3, %s359_s17  ;;  %s364_s20 = sshll.u32 %s442_s18, 4  ;;  %s365_s20 = int_to_ptr.vmem [resolvable:$false] %s364_s20 }
  0x24   : > { %s366_s24 = scalar_lea.vmem %s365_s20, 256  ;;  %p367_p11 = scmp.lt.s32.totalorder %s533_s3, %s365_s20 }
  0x25   : > { %p362_p4 = pnand %p360_p2, %p346_p3  ;;  %p368_p5 = scmp.lt.s32.totalorder %s366_s24, %s359_s17 }
  0x27   : > { %p363_p12 = pneg %p362_p4  ;;  %p369_p8 = por %p368_p5, %p367_p11 }
  0x29   : > { %p370_p9 = pnand %p369_p8, %p363_p12 }
  0x2b   : > { %373 = shalt.err (!%p370_p9)
}
  0x2c   : > { %299 = dma.hbm_to_vmem [thread:$0]  (!%p529_p13), %s525_s29, 128, %s533_s3, %s114_s5  }
  0x2d   : > { %p636_p0 = scmp.lt.s32.totalorder %s440_s14, 3  ;;  %p637_p1 = scmp.ge.s32.totalorder %s440_s14, 1 }
  0x2f   : > { %p130_p3 = pnand %p637_p1, %p636_p0 }
  0x30   : > { %s567_s25 = sand.u32 (!%p130_p3), 1, %s432_s12  }
  0x31   : > { %133 = sbr.rel (%p130_p3) target bundleno = 151 (0x97), region = 28  ;;  %s285_s26 = sshll.u32 (!%p130_p3), %s567_s25, 3 }
  0x32   : > { %s136_s27 = scalar_lea.sflag (!%p130_p3), [#allocation4], %s567_s25  ;;  %s139_s28 = scalar_lea.vmem (!%p130_p3), [#allocation3], %s285_s26 }
  0x38   : > { %419 = dma.done.wait (%p505_p6), %s136_s27, 128  }
  0x39   : > { %421 = vsyncadd (%p505_p6), %s136_s27, 4294967168  ;;  %v160_v0 = vld [vmem:[%s139_s28] sm:$0xff]  ;;  %s187_s21 = sld [smem:[#allocation2]]  ;;  %s159_s30 = scalar_lea.vmem [#allocation6], %s285_s26 }
  0x3a   : > { %v161_v1 = vrot.slane %v160_v0, 4  ;;  %s209_s3 = sshll.u32 %s159_s30, 4  ;;  %s289_s4 = sshll.u32 %s483_s0, 7  ;;  %s580_s3 = int_to_ptr.vmem [resolvable:$true] %s209_s3 }
  0x3b   : > { %s585_s7 = scalar_lea.hbm %s629_s2, %s289_s4  ;;  %s196_s8 = scalar_lea.sflag [#allocation5], %s567_s25 }
  0x3c   : > { %v162_v2 = vadd.f32 %v161_v1, %v160_v0  ;;  %s374_s9 = scalar_lea.vmem %s580_s3, 128  ;;  %p638_p11 = scmp.ne.s32.totalorder %s633_s22, 0 }
  0x3d   : > { %p375_p6 = scmp.ne.s32.totalorder %s580_s3, %s374_s9  ;;  %s443_s0 = smov [#allocation6]  }
  0x3e   : > { %v163_v3 = vrot.slane %v162_v2, 2  ;;  %s378_s10 = sshll.u32 %s443_s0, 4  ;;  %s379_s10 = int_to_ptr.vmem [resolvable:$false] %s378_s10 }
  0x3f   : > { %s188_s29 = ssub.f32 1.0, %s187_s21  ;;  %v191_v25 = vstv %s187_s21  ;;  %p376_p12 = pnand %p375_p6, %p638_p11 }
  0x40   : > { %v164_v4 = vadd.f32 %v163_v3, %v162_v2  ;;  %s380_s15 = scalar_lea.vmem %s379_s10, 256  ;;  %p381_p7 = scmp.lt.s32.totalorder %s580_s3, %s379_s10 }
  0x41   : > { %v189_v23 = vstv %s188_s29  ;;  %p377_p13 = pneg %p376_p12  ;;  %p382_p10 = scmp.lt.s32.totalorder %s380_s15, %s374_s9 }
  0x42   : > { %v165_v5 = vrot.slane %v164_v4, 1 }
  0x43   : > { %p383_p2 = por %p382_p10, %p381_p7 }
  0x44   : > { %v166_v6 = vadd.f32 %v165_v5, %v164_v4 }
  0x45   : > { %p384_p4 = pnand %p383_p2, %p377_p13 }
  0x46   : > { %v168_v7 = vmul.f32 0.125, %v166_v6 }
  0x48   : > { %v169_v8 = vsub.f32 %v160_v0, %v168_v7 }
  0x4a   : > { %v170_v9 = vmul.f32 %v169_v8, %v169_v8 }
  0x4c   : > { %v171_v10 = vrot.slane %v170_v9, 4 }
  0x4e   : > { %v172_v11 = vadd.f32 %v171_v10, %v170_v9 }
  0x50   : > { %v173_v12 = vrot.slane %v172_v11, 2 }
  0x52   : > { %v174_v13 = vadd.f32 %v173_v12, %v172_v11 }
  0x54   : > { %v175_v14 = vrot.slane %v174_v13, 1 }
  0x56   : > { %v176_v15 = vadd.f32 %v175_v14, %v174_v13 }
  0x58   : > { %v177_v16 = vmul.f32 0.14285715, %v176_v15 }
  0x5a   : > { %338 = vrsqrt.f32 %v177_v16 }
  0x64   : > { %v339_v17 = vpop.eup %338 }
  0x65   : > { %v179_v18 = vmul.f32 %v339_v17, %v169_v8 }
  0x67   : > { %v180_v19 = vadd.f32 1e-08, %v179_v18 }
  0x69   : > { %v287_v20 = vmul.f32 -1.442695, %v180_v19 }
  0x6b   : > { %340 = vpow2.f32 %v287_v20 }
  0x75   : > { %v341_v21 = vpop.eup %340 }
  0x76   : > { %v184_v22 = vadd.f32 1.0, %v341_v21 }
  0x78   : > { %342 = vrcp.f32 %v184_v22 }
  0x82   : > { %v343_v24 = vpop.eup %342 }
  0x83   : > { %v190_v26 = vmul.f32 %v343_v24, %v189_v23 }
  0x85   : > { %v192_v27 = vadd.f32 %v191_v25, %v190_v26 }
  0x87   : > { %v193_v28 = vmul.f32 %v192_v27, %v160_v0 }
  0x89   : > { %194 = vst [vmem:[%s159_s30] sm:$0xff] %v193_v28 }
  0x8a   : > { %387 = shalt.err (!%p384_p4)
}
  0x8b   : > { %s388_s17 = scalar_lea.hbm %s585_s7, 128  ;;  %s392_s24 = scalar_lea.hbm %s629_s2, 256 }
  0x8c   : > { %p389_p5 = scmp.ne.s32.totalorder %s585_s7, %s388_s17  ;;  %p393_p0 = scmp.lt.u32.totalorder %s585_s7, %s629_s2 }
  0x8d   : > { %p394_p1 = scmp.lt.u32.totalorder %s392_s24, %s388_s17  ;;  %p396_p6 = scmp.lt.u32.totalorder %s388_s17, %s585_s7 }
  0x8e   : > { %p390_p8 = pnand %p389_p5, %p638_p11 }
  0x8f   : > { %p395_p3 = por %p394_p1, %p393_p0 }
  0x90   : > { %p391_p9 = pneg %p390_p8 }
  0x91   : > { %p397_p12 = por %p396_p6, %p395_p3 }
  0x93   : > { %p398_p13 = pnand %p397_p12, %p391_p9 }
  0x95   : > { %401 = shalt.err (!%p398_p13)
}
  0x96   : > { %294 = dma.vmem_to_hbm [thread:$0]  (%p638_p11), %s580_s3, 128, %s585_s7, %s196_s8  }
  0x97 PF: > { %s221_s27 = sand.u32 1, %s428_s11   ;;  %p639_p7 = scmp.ne.s32.totalorder %s634_s23, 0 }
  0x98   : > { %p640_p10 = scmp.ge.s32.totalorder %s440_s14, 2  ;;  %s222_s28 = scalar_lea.sflag [#allocation5], %s221_s27 }
  0x9a   : > { %p301_p2 = pnand %p640_p10, %p639_p7 }
  0x9c   : > { %423 = dma.done.wait (!%p301_p2), %s222_s28, 128  }
  0x9d   : > { %425 = vsyncadd (!%p301_p2), %s222_s28, 4294967168  ;;  %p16_p4 = scmp.ge.s32.totalorder %s487_s16, 4   ;;  %s641_s11 = smov %s432_s12 }
  0x9e   : > { %s642_s12 = smov %s436_s13  ;;  %s643_s13 = smov %s499_s19 }
  0x9f   : > { %s644_s14 = smov %s487_s16  ;;  %18 = sbr.rel (!%p16_p4) target bundleno = 7 (0x7), region = 73 }
  0xa6   :  { %227 = vsyncpa [#allocation4], 1 }
  0xa7   :  { %229 = vsyncpa [#allocation4 + $0x1], 1 }
  0xa8   :  { %230 = vsyncpa [#allocation5], 1 }
  0xa9   :  { %232 = vsyncpa [#allocation5 + $0x1], 1 }

</bundles_post_ra>
